<compile_context>
chip_gen: v7x
topology: tpu7x:2x2x1
jax: 0.10.0
libtpu: 0.0.40
codegen_flags: <defaults>
</compile_context>

<pallas_src>
import jax
import jax.numpy as jnp
from jax.experimental import pallas as pl
from jax.experimental.pallas import tpu as pltpu

_LANE = 1024                   # preferred lane-dense slab width (multiple of 128)
_MAX_LANE = 16384              # guard: don't build absurdly wide slabs (VMEM blowup)
_TARGET_TILE_BYTES = 4 << 20   # ~4 MiB per stream buffer (x3 streams x2 bufs = 24 MiB)
_MIN_GRID_STEPS = 8            # >= 4 pipeline steps per TensorCore on v7x (2 TCs)
_SMALL_BYTES = 256 * 1024      # below this, XLA fusion beats kernel launch overhead


def _skip_kernel(w_ref, f1_ref, f2_ref, out_ref):
    """out = (1 - w) * f1 + w * f2, blended in f32, cast on store."""
    w = w_ref[0]                                    # scalar weight from SMEM
    f1 = f1_ref[...].astype(jnp.float32)
    f2 = f2_ref[...].astype(jnp.float32)
    out_ref[...] = ((1.0 - w) * f1 + w * f2).astype(out_ref.dtype)


def _round_up(x: int, m: int) -> int:
    return -(-x // m) * m


def _slab_shape(shape, total):
    """A (rows, lane) view with lane % 128 == 0 reachable by a FREE reshape, or None."""
    if total % _LANE == 0:
        return total // _LANE, _LANE
    last = shape[-1] if len(shape) else 1
    if 128 <= last <= _MAX_LANE and last % 128 == 0:
        return total // last, last
    return None


@jax.jit
def residue_learnable_skip_connection(features1: jax.Array,
                                      features2: jax.Array,
                                      weight: jax.Array) -> jax.Array:
    """(1 - weight) * features1 + weight * features2 via a Pallas TPU kernel."""
    assert features1.shape == features2.shape
    assert features1.dtype == features2.dtype
    orig_shape = features1.shape
    dtype = features1.dtype
    total = features1.size
    itemsize = jnp.dtype(dtype).itemsize
    nbytes = total * itemsize

    w32 = jnp.asarray(weight, dtype=jnp.float32)

    slab = _slab_shape(orig_shape, total) if nbytes >= _SMALL_BYTES else None
    if slab is None:
        # Tiny inputs (launch overhead dominates) or ragged shapes with no free
        # lane-dense reshape: the XLA fused blend is already at the HBM roofline
        # and avoids pad/slice copies of the full tensors.
        f1 = features1.astype(jnp.float32)
        f2 = features2.astype(jnp.float32)
        return ((1.0 - w32) * f1 + w32 * f2).astype(dtype)

    rows, lane = slab
    f1 = features1.reshape(rows, lane)   # free reshape (no data movement)
    f2 = features2.reshape(rows, lane)

    # Row tile: ~_TARGET_TILE_BYTES per VMEM buffer (dtype-scaled), a multiple
    # of 8, capped so the grid keeps >= _MIN_GRID_STEPS steps for pipelining
    # and megacore sharding.  Pallas masks the partial last block if needed.
    tile_rows = max(8, (_TARGET_TILE_BYTES // (lane * itemsize)) // 8 * 8)
    steps_cap = max(8, _round_up(pl.cdiv(rows, _MIN_GRID_STEPS), 8))
    tile_rows = min(tile_rows, steps_cap)
    if tile_rows >= rows:
        tile_rows = rows                 # single full-extent block (layout exception)
    grid = (pl.cdiv(rows, tile_rows),)

    w_arr = w32.reshape((1,))

    out2d = pl.pallas_call(
        _skip_kernel,
        out_shape=jax.ShapeDtypeStruct((rows, lane), dtype),
        grid_spec=pltpu.PrefetchScalarGridSpec(
            num_scalar_prefetch=0,
            grid=grid,
            in_specs=[
                pl.BlockSpec(memory_space=pltpu.MemorySpace.SMEM),   # scalar weight
                pl.BlockSpec((tile_rows, lane), lambda i: (i, 0)),   # features1
                pl.BlockSpec((tile_rows, lane), lambda i: (i, 0)),   # features2
            ],
            out_specs=pl.BlockSpec((tile_rows, lane), lambda i: (i, 0)),
        ),
        compiler_params=pltpu.CompilerParams(
            dimension_semantics=("parallel",),
            vmem_limit_bytes=40 * 1024 * 1024,
        ),
        # Advisory: large memory-bound op -> let XLA overlap surrounding HLOs.
        cost_estimate=pl.CostEstimate(
            flops=3 * total, transcendentals=0, bytes_accessed=3 * nbytes),
        # NOTE(perf review): input_output_aliases intentionally removed — with a
        # non-donated input, XLA would insert a defensive full copy of features1,
        # costing more HBM traffic than the alias saves.
    )(w_arr, f1, f2)

    return out2d.reshape(orig_shape)


def forward(residue1: dict, residue2: dict, weight: jax.Array) -> dict:
    """Mirrors the PyTorch module's forward: updates residue1['features']."""
    out = dict(residue1)
    out["features"] = residue_learnable_skip_connection(
        residue1["features"], residue2["features"], weight)
    return out


if __name__ == "__main__":
    key = jax.random.PRNGKey(0)
    k1, k2, k3, k4, k5, k6 = jax.random.split(key, 6)

    # Parameter from __init__: scalar weight = 0.01 (deterministic init).
    weight = jnp.float32(0.01)

    def check(f1, f2, atol=1e-6, rtol=1e-6):
        out = forward({"features": f1}, {"features": f2}, weight)
        res = jax.block_until_ready(out["features"])
        ref = (1.0 - weight) * f1 + weight * f2
        assert res.shape == f1.shape and res.dtype == f1.dtype
        assert jnp.allclose(res, ref, atol=atol, rtol=rtol), "mismatch"

    # 1) Pallas path: total % 1024 == 0 -> free (128, 1024) slab, grid=(8,).
    check(jax.random.normal(k1, (512, 256), dtype=jnp.float32),
          jax.random.normal(k2, (512, 256), dtype=jnp.float32))

    # 2) Pallas path: last dim multiple of 128 (lane=384), partial last block masked.
    check(jax.random.normal(k3, (700, 384), dtype=jnp.float32),
          jax.random.normal(k4, (700, 384), dtype=jnp.float32))

    # 3) Module-scale tiny shape (8 residues x 32-dim features) -> XLA fast path.
    check(jax.random.normal(k5, (8, 32), dtype=jnp.float32),
          jax.random.normal(k6, (8, 32), dtype=jnp.float32))

    print("KERNEL_OK")
</pallas_src>

<mosaic_0001>
module attributes {stable_mosaic.version = 11 : i64} {
  func.func @_skip_kernel(%arg0: i32, %arg1: memref<1xf32, #tpu.memory_space<smem>>, %arg2: memref<16x1024xf32, #tpu.memory_space<vmem>>, %arg3: memref<16x1024xf32, #tpu.memory_space<vmem>>, %arg4: memref<16x1024xf32, #tpu.memory_space<vmem>>) attributes {dimension_semantics = [#tpu.dimension_semantics<parallel>], iteration_bounds = array<i64: 8>, scalar_prefetch = 0 : i64, scratch_operands = 0 : i64, tpu.core_type = #tpu.core_type<tc>, window_params = [{transform_indices = @transform_0, window_bounds = array<i64: 1>}, {transform_indices = @transform_1, window_bounds = array<i64: 16, 1024>}, {transform_indices = @transform_2, window_bounds = array<i64: 16, 1024>}, {transform_indices = @transform_3, window_bounds = array<i64: 16, 1024>}]} {
    %c0 = arith.constant 0 : index
    %0 = memref.load %arg1[%c0] : memref<1xf32, #tpu.memory_space<smem>>
    %c0_0 = arith.constant 0 : index
    %c0_1 = arith.constant 0 : index
    %1 = vector.load %arg2[%c0_0, %c0_1] : memref<16x1024xf32, #tpu.memory_space<vmem>>, vector<16x1024xf32>
    %c0_2 = arith.constant 0 : index
    %c0_3 = arith.constant 0 : index
    %2 = vector.load %arg3[%c0_2, %c0_3] : memref<16x1024xf32, #tpu.memory_space<vmem>>, vector<16x1024xf32>
    %cst = arith.constant 1.000000e+00 : f32
    %3 = arith.subf %cst, %0 : f32
    %4 = vector.broadcast %3 : f32 to vector<16x1024xf32>
    %5 = arith.mulf %4, %1 : vector<16x1024xf32>
    %6 = vector.broadcast %0 : f32 to vector<16x1024xf32>
    %7 = arith.mulf %6, %2 : vector<16x1024xf32>
    %8 = arith.addf %5, %7 : vector<16x1024xf32>
    %c0_4 = arith.constant 0 : index
    %c0_5 = arith.constant 0 : index
    %9 = vector.load %arg4[%c0_4, %c0_5] : memref<16x1024xf32, #tpu.memory_space<vmem>>, vector<16x1024xf32>
    tpu.vector_store %arg4[%c0_4, %c0_5], %8 {strides = array<i32>} : memref<16x1024xf32, #tpu.memory_space<vmem>>, vector<16x1024xf32>,
    return
  }
  func.func @transform_0(%arg0: i32) -> i32 {
    %c0_i32 = arith.constant 0 : i32
    %c0_i32_0 = arith.constant 0 : i32
    return %c0_i32 : i32
  }
  func.func @transform_1(%arg0: i32) -> (i32, i32) {
    %c0_i32 = arith.constant 0 : i32
    %c0_i32_0 = arith.constant 0 : i32
    return %arg0, %c0_i32 : i32, i32
  }
  func.func @transform_2(%arg0: i32) -> (i32, i32) {
    %c0_i32 = arith.constant 0 : i32
    %c0_i32_0 = arith.constant 0 : i32
    return %arg0, %c0_i32 : i32, i32
  }
  func.func @transform_3(%arg0: i32) -> (i32, i32) {
    %c0_i32 = arith.constant 0 : i32
    %c0_i32_0 = arith.constant 0 : i32
    return %arg0, %c0_i32 : i32, i32
  }
}

</mosaic_0001>

<bundles_post_ra>
// kernel: residue_learnable_skip_connection.1
= control target key start
LH: loop header
LB: loop body
LE: loop exit
PB: predicated region body
PF: predicated region fallthrough
CT: control target
= control target key end

     0   :  { %s433_s14 = smov 0   ;;  %s543_s0 = inlined_call_operand.<no memory space> [shape: f32[1], index: 0, kind: input, shape index: {}]   ;;  %s544_s1 = inlined_call_operand.vmem [shape: f32[128,1024], index: 1, kind: input, shape index: {}]   ;;  %s545_s2 = inlined_call_operand.vmem [shape: f32[128,1024], index: 2, kind: input, shape index: {}]   ;;  %s546_s3 = inlined_call_operand.vmem [shape: f32[128,1024], index: 3, kind: output, shape index: {}]  }
   0x1   :  { %8 = sst [smem:[#allocation2]] %s543_s0 }
   0x2 LB: > { %s375_s15 = sadd.s32 4294967295, %s408_s14   ;;  %p379_p0 = scmp.ge.s32.totalorder %s408_s14, 1  ;;  %s408_s14 = sphi %s433_s14, %s14_s14  }
   0x3   : > { %p152_p1 = scmp.lt.s32.totalorder %s408_s14, 9 }
   0x5   : > { %p153_p2 = pnand %p379_p0, %p152_p1 }
   0x6   : > { %s380_s16 = sshll.u32 (!%p153_p2), %s375_s15, 1  ;;  %s205_s17 = sld [smem:[#allocation2]] (!%p153_p2) }
   0x7   : > { %156 = sbr.rel (%p153_p2) target bundleno = 35 (0x23), region = 32  ;;  %p185_p3 = scmp.lt.s32.totalorder (!%p153_p2), %s380_s16, 15 }
   0xc   : > { %v451_v0 = vstv (!%p153_p2), %s205_s17  ;;  %s238_s24 = ssub.f32 (!%p153_p2), 1.0, %s205_s17 }
   0xe   : > { %s548_s16 = smov (!%p185_p3, %s380_s16), 15  ;;  %v460_v8 = vstv %s238_s24 }
   0xf   : > { %s391_s0 = sshll.u32 %s548_s16, 6 }
  0x10   : > { %s444_s20 = scalar_lea.vmem %s544_s1, %s391_s0  ;;  %s449_s23 = scalar_lea.vmem %s545_s2, %s391_s0 }
  0x11   : > { %v206_v1 = vld [vmem:[%s444_s20] sm:$0xff]  ;;  %v207_v3 = vld [vmem:[%s444_s20 + $0x8] sm:$0xff]  ;;  %v208_v6 = vld [vmem:[%s444_s20 + $0x10] sm:$0xff]  ;;  %s477_s27 = scalar_lea.vmem %s546_s3, %s391_s0 }
  0x12   : > { %v222_v2 = vld [vmem:[%s449_s23] sm:$0xff]  ;;  %v223_v5 = vld [vmem:[%s449_s23 + $0x8] sm:$0xff]  ;;  %v224_v7 = vld [vmem:[%s449_s23 + $0x10] sm:$0xff]  ;;  %v240_v14 = vmul.f32 %v460_v8, %v206_v1  ;;  %v241_v15 = vmul.f32 %v460_v8, %v207_v3  ;;  %v242_v16 = vmul.f32 %v460_v8, %v208_v6 }
  0x13   : > { %v257_v4 = vmul.f32 %v451_v0, %v222_v2  ;;  %v258_v9 = vmul.f32 %v451_v0, %v223_v5  ;;  %v259_v10 = vmul.f32 %v451_v0, %v224_v7  ;;  %v209_v11 = vld [vmem:[%s444_s20 + $0x18] sm:$0xff]  ;;  %v210_v13 = vld [vmem:[%s444_s20 + $0x20] sm:$0xff]  ;;  %v211_v19 = vld [vmem:[%s444_s20 + $0x28] sm:$0xff] }
  0x14   : > { %v225_v12 = vld [vmem:[%s449_s23 + $0x18] sm:$0xff]  ;;  %v243_v17 = vmul.f32 %v460_v8, %v209_v11  ;;  %v226_v18 = vld [vmem:[%s449_s23 + $0x20] sm:$0xff]  ;;  %v227_v20 = vld [vmem:[%s449_s23 + $0x28] sm:$0xff]  ;;  %v244_v22 = vmul.f32 %v460_v8, %v210_v13  ;;  %v245_v24 = vmul.f32 %v460_v8, %v211_v19 }
  0x15   : > { %v260_v21 = vmul.f32 %v451_v0, %v225_v12  ;;  %v261_v23 = vmul.f32 %v451_v0, %v226_v18  ;;  %v212_v25 = vld [vmem:[%s444_s20 + $0x30] sm:$0xff]  ;;  %v213_v27 = vld [vmem:[%s444_s20 + $0x38] sm:$0xff]  ;;  %v273_v28 = vadd.f32 %v257_v4, %v240_v14  ;;  %v274_v29 = vadd.f32 %v258_v9, %v241_v15  ;;  %v214_v33 = vld [vmem:[%s444_s20 + $0x40] sm:$0xff] }
  0x16   : > { %v228_v26 = vld [vmem:[%s449_s23 + $0x30] sm:$0xff]  ;;  %v275_v30 = vadd.f32 %v259_v10, %v242_v16  ;;  %v262_v31 = vmul.f32 %v451_v0, %v227_v20  ;;  %v229_v32 = vld [vmem:[%s449_s23 + $0x38] sm:$0xff]  ;;  %v230_v34 = vld [vmem:[%s449_s23 + $0x40] sm:$0xff]  ;;  %v246_v37 = vmul.f32 %v460_v8, %v212_v25  ;;  %v247_v43 = vmul.f32 %v460_v8, %v213_v27 }
  0x17   : > { %v276_v35 = vadd.f32 %v260_v21, %v243_v17  ;;  %v277_v36 = vadd.f32 %v261_v23, %v244_v22  ;;  %v263_v38 = vmul.f32 %v451_v0, %v228_v26  ;;  %v215_v39 = vld [vmem:[%s444_s20 + $0x48] sm:$0xff]  ;;  %v216_v41 = vld [vmem:[%s444_s20 + $0x50] sm:$0xff]  ;;  %289 = vst [vmem:[%s477_s27] sm:$0xff] %v273_v28  ;;  %290 = vst [vmem:[%s477_s27 + $0x8] sm:$0xff] %v274_v29 }
  0x18   : > { %v231_v40 = vld [vmem:[%s449_s23 + $0x48] sm:$0xff]  ;;  %291 = vst [vmem:[%s477_s27 + $0x10] sm:$0xff] %v275_v30  ;;  %v278_v42 = vadd.f32 %v262_v31, %v245_v24  ;;  %v264_v44 = vmul.f32 %v451_v0, %v229_v32  ;;  %v248_v45 = vmul.f32 %v460_v8, %v214_v33  ;;  %v232_v46 = vld [vmem:[%s449_s23 + $0x50] sm:$0xff]  ;;  %v217_v47 = vld [vmem:[%s444_s20 + $0x58] sm:$0xff]  ;;  %v265_v50 = vmul.f32 %v451_v0, %v230_v34 }
  0x19   : > { %v233_v48 = vld [vmem:[%s449_s23 + $0x58] sm:$0xff]  ;;  %292 = vst [vmem:[%s477_s27 + $0x18] sm:$0xff] %v276_v35  ;;  %293 = vst [vmem:[%s477_s27 + $0x20] sm:$0xff] %v277_v36  ;;  %v279_v49 = vadd.f32 %v263_v38, %v246_v37  ;;  %v249_v51 = vmul.f32 %v460_v8, %v215_v39  ;;  %v266_v52 = vmul.f32 %v451_v0, %v231_v40  ;;  %v218_v53 = vld [vmem:[%s444_s20 + $0x60] sm:$0xff] }
  0x1a   : > { %v234_v54 = vld [vmem:[%s449_s23 + $0x60] sm:$0xff]  ;;  %v219_v55 = vld [vmem:[%s444_s20 + $0x68] sm:$0xff]  ;;  %294 = vst [vmem:[%s477_s27 + $0x28] sm:$0xff] %v278_v42  ;;  %v280_v56 = vadd.f32 %v264_v44, %v247_v43  ;;  %v250_v57 = vmul.f32 %v460_v8, %v216_v41  ;;  %v267_v58 = vmul.f32 %v451_v0, %v232_v46  ;;  %v251_v59 = vmul.f32 %v460_v8, %v217_v47  ;;  %v220_v61 = vld [vmem:[%s444_s20 + $0x70] sm:$0xff] }
  0x1b   : > { %v235_v60 = vld [vmem:[%s449_s23 + $0x68] sm:$0xff]  ;;  %v236_v62 = vld [vmem:[%s449_s23 + $0x70] sm:$0xff]  ;;  %295 = vst [vmem:[%s477_s27 + $0x30] sm:$0xff] %v279_v49  ;;  %v281_v63 = vadd.f32 %v265_v50, %v248_v45  ;;  %v282_v1 = vadd.f32 %v266_v52, %v249_v51  ;;  %v268_v2 = vmul.f32 %v451_v0, %v233_v48  ;;  %v252_v3 = vmul.f32 %v460_v8, %v218_v53  ;;  %v221_v4 = vld [vmem:[%s444_s20 + $0x78] sm:$0xff] }
  0x1c   : > { %v237_v5 = vld [vmem:[%s449_s23 + $0x78] sm:$0xff]  ;;  %296 = vst [vmem:[%s477_s27 + $0x38] sm:$0xff] %v280_v56  ;;  %v283_v6 = vadd.f32 %v267_v58, %v250_v57  ;;  %v269_v7 = vmul.f32 %v451_v0, %v234_v54  ;;  %v253_v9 = vmul.f32 %v460_v8, %v219_v55  ;;  %v270_v10 = vmul.f32 %v451_v0, %v235_v60 }
  0x1d   : > { %297 = vst [vmem:[%s477_s27 + $0x40] sm:$0xff] %v281_v63  ;;  %298 = vst [vmem:[%s477_s27 + $0x48] sm:$0xff] %v282_v1  ;;  %v284_v11 = vadd.f32 %v268_v2, %v251_v59  ;;  %v254_v12 = vmul.f32 %v460_v8, %v220_v61  ;;  %v271_v13 = vmul.f32 %v451_v0, %v236_v62 }
  0x1e   : > { %v255_v14 = vmul.f32 %v460_v8, %v221_v4  ;;  %299 = vst [vmem:[%s477_s27 + $0x50] sm:$0xff] %v283_v6  ;;  %v285_v15 = vadd.f32 %v269_v7, %v252_v3  ;;  %v286_v16 = vadd.f32 %v270_v10, %v253_v9  ;;  %v272_v17 = vmul.f32 %v451_v0, %v237_v5 }
  0x1f   : > { %300 = vst [vmem:[%s477_s27 + $0x58] sm:$0xff] %v284_v11  ;;  %v287_v18 = vadd.f32 %v271_v13, %v254_v12 }
  0x20   : > { %301 = vst [vmem:[%s477_s27 + $0x60] sm:$0xff] %v285_v15  ;;  %302 = vst [vmem:[%s477_s27 + $0x68] sm:$0xff] %v286_v16  ;;  %v288_v19 = vadd.f32 %v272_v17, %v255_v14 }
  0x21   : > { %303 = vst [vmem:[%s477_s27 + $0x70] sm:$0xff] %v287_v18 }
  0x22   : > { %304 = vst [vmem:[%s477_s27 + $0x78] sm:$0xff] %v288_v19 }
  0x23 PF: > { %s14_s14 = sadd.s32 1, %s408_s14  }
  0x24   : > { %p11_p4 = scmp.ge.s32.totalorder %s14_s14, 10  }
  0x26   :  { %13 = sbr.rel (!%p11_p4) target bundleno = 2 (0x2), region = 65 }

</bundles_post_ra>
